<compile_context>
chip_gen: v6e
topology: v6e:2x2x1
jax: 0.10.0
libtpu: 0.0.40
codegen_flags: <defaults>
</compile_context>

<pallas_src>
import jax
import jax.numpy as jnp
from jax import lax
from jax.experimental import pallas as pl
from jax.experimental.pallas import tpu as pltpu


def _round_up(x: int, m: int) -> int:
    return ((x + m - 1) // m) * m


def _dist_linear_kernel(x_ref, v_ref, s_ref, o_ref):
    x = x_ref[...]          # (tb, Dp) float32 -- raw (unnormalized) features
    v = v_ref[...]          # (tc, Dp) float32 -- raw WeightNorm 'v' rows
    col_scale = s_ref[...]  # (1, tc)  float32 -- scale_factor * g / ||v|| (precomputed)

    # Heavy op: plain GEMM on the MXU, contracting the feature dim of both
    # operands. HIGHEST keeps full f32 fidelity to the PyTorch module; operands
    # could be cast to bf16 (keeping f32 accumulation) for ~2-4x MXU throughput
    # on v6e/v7x if the cosine-head tolerance allows.
    acc = lax.dot_general(
        x, v,
        dimension_numbers=(((1,), (1,)), ((), ())),
        preferred_element_type=jnp.float32,
        precision=lax.Precision.HIGHEST,
    )                                                     # (tb, tc)

    # Row normalization folded into a tiny (tb, 1) epilogue scale
    # (broadcast over the (tb, tc) output is free on the VPU).
    ss = jnp.sum(x * x, axis=1, keepdims=True)            # (tb, 1)
    row_scale = pl.reciprocal(jnp.sqrt(ss) + 1e-5)        # exact; approx=True possible

    o_ref[...] = (acc * row_scale * col_scale).astype(o_ref.dtype)


def dist_linear(x, weight_v, weight_g, outdim, *, tb=None, tc=None):
    """Pallas implementation of distLinear.forward.

    x        : (B, indim) float32
    weight_v : (outdim, indim) float32   -- WeightNorm 'v' parameter
    weight_g : (outdim, 1) float32       -- WeightNorm 'g' parameter
    """
    B, D = x.shape
    C, _ = weight_v.shape
    scale_factor = 2.0 if outdim <= 200 else 10.0

    x = x.astype(jnp.float32)
    weight_v = weight_v.astype(jnp.float32)
    weight_g = weight_g.astype(jnp.float32)

    # Per-class scale computed once in the wrapper (WeightNorm params are static
    # across forward calls), laid out lane-dense as a (1, C) row.
    v_norm = jnp.sqrt(jnp.sum(weight_v * weight_v, axis=1, keepdims=True))  # (C, 1)
    col_scale = (scale_factor * weight_g / v_norm).reshape(1, C)

    # Tile sizes: multiples of 8 (sublane) / 128 (lane), capped at 256
    # (MXU-aligned for v6e/v7x's 256x256 array; still 128-aligned for v5e).
    if tb is None:
        tb = min(256, _round_up(B, 8))
    if tc is None:
        tc = min(256, _round_up(C, 128))

    Bp = _round_up(B, tb)
    Cp = _round_up(C, tc)
    Dp = _round_up(D, 128)

    # Zero padding is semantically neutral (does not change norms or dot
    # products); padded output columns get col_scale == 0 and are sliced off.
    xp = jnp.pad(x, ((0, Bp - B), (0, Dp - D)))
    vp = jnp.pad(weight_v, ((0, Cp - C), (0, Dp - D)))
    sp = jnp.pad(col_scale, ((0, 0), (0, Cp - C)))

    grid = (Bp // tb, Cp // tc)

    # VMEM budget: double-buffered x / v / col_scale tiles + output tile,
    # plus headroom. (For very large D, add a third "arbitrary" K axis with a
    # VMEM f32 accumulator instead of keeping D resident.)
    vmem_need = 2 * 4 * (tb * Dp + tc * Dp + tb * tc + tc) + (2 << 20)
    vmem_limit = int(min(max(vmem_need, 32 * 1024 * 1024), 96 * 1024 * 1024))

    out = pl.pallas_call(
        _dist_linear_kernel,
        out_shape=jax.ShapeDtypeStruct((Bp, Cp), jnp.float32),
        grid_spec=pltpu.PrefetchScalarGridSpec(
            num_scalar_prefetch=0,
            grid=grid,
            in_specs=[
                pl.BlockSpec((tb, Dp), lambda i, j: (i, 0)),   # x tile
                pl.BlockSpec((tc, Dp), lambda i, j: (j, 0)),   # v tile
                pl.BlockSpec((1, tc), lambda i, j: (0, j)),    # col scale tile
            ],
            out_specs=pl.BlockSpec((tb, tc), lambda i, j: (i, j)),
        ),
        compiler_params=pltpu.CompilerParams(
            dimension_semantics=("parallel", "parallel"),
            vmem_limit_bytes=vmem_limit,
        ),
    )(xp, vp, sp)

    return out[:B, :C]


def dist_linear_ref(x, weight_v, weight_g, outdim):
    """Plain-JAX reference matching the PyTorch module."""
    scale_factor = 2.0 if outdim <= 200 else 10.0
    x_norm = jnp.linalg.norm(x, axis=1, keepdims=True)
    x_n = x / (x_norm + 1e-5)
    v_norm = jnp.linalg.norm(weight_v, axis=1, keepdims=True)
    w = weight_g * weight_v / v_norm
    return scale_factor * jnp.dot(x_n, w.T, precision=lax.Precision.HIGHEST)


if __name__ == "__main__":
    # Small shapes consistent with the module: B x indim features, outdim classes.
    B, indim, outdim = 16, 128, 64

    key = jax.random.PRNGKey(0)
    kx, kv, kg = jax.random.split(key, 3)

    x = jax.random.normal(kx, (B, indim), dtype=jnp.float32)
    # Deterministic synthetic parameters (shapes as in nn.Linear + WeightNorm dim=0).
    weight_v = jax.random.normal(kv, (outdim, indim), dtype=jnp.float32) * 0.05
    weight_g = jax.random.uniform(kg, (outdim, 1), dtype=jnp.float32,
                                  minval=0.5, maxval=1.5)

    out = dist_linear(x, weight_v, weight_g, outdim)
    out = jax.block_until_ready(out)

    ref = dist_linear_ref(x, weight_v, weight_g, outdim)
    assert out.shape == (B, outdim)
    assert jnp.allclose(out, ref, atol=1e-4, rtol=1e-4), "mismatch vs reference"

    print("KERNEL_OK")
</pallas_src>

<mosaic_0001>
module attributes {stable_mosaic.version = 11 : i64} {
  func.func @_dist_linear_kernel(%arg0: i32, %arg1: i32, %arg2: memref<16x128xf32, #tpu.memory_space<vmem>>, %arg3: memref<128x128xf32, #tpu.memory_space<vmem>>, %arg4: memref<1x128xf32, #tpu.memory_space<vmem>>, %arg5: memref<16x128xf32, #tpu.memory_space<vmem>>) attributes {dimension_semantics = [#tpu.dimension_semantics<parallel>, #tpu.dimension_semantics<parallel>], iteration_bounds = array<i64: 1, 1>, scalar_prefetch = 0 : i64, scratch_operands = 0 : i64, tpu.core_type = #tpu.core_type<tc>, window_params = [{transform_indices = @transform_0, window_bounds = array<i64: 16, 128>}, {transform_indices = @transform_1, window_bounds = array<i64: 128, 128>}, {transform_indices = @transform_2, window_bounds = array<i64: 1, 128>}, {transform_indices = @transform_3, window_bounds = array<i64: 16, 128>}]} {
    %c0 = arith.constant 0 : index
    %c0_0 = arith.constant 0 : index
    %0 = vector.load %arg2[%c0, %c0_0] : memref<16x128xf32, #tpu.memory_space<vmem>>, vector<16x128xf32>
    %c0_1 = arith.constant 0 : index
    %c0_2 = arith.constant 0 : index
    %1 = vector.load %arg3[%c0_1, %c0_2] : memref<128x128xf32, #tpu.memory_space<vmem>>, vector<128x128xf32>
    %c0_3 = arith.constant 0 : index
    %c0_4 = arith.constant 0 : index
    %2 = vector.load %arg4[%c0_3, %c0_4] : memref<1x128xf32, #tpu.memory_space<vmem>>, vector<1x128xf32>
    %cst = arith.constant dense<0.000000e+00> : vector<16x128xf32>
    %3 = tpu.matmul %0, %1, %cst {dimension_numbers = #tpu.dot_dimension_numbers<[1], [1], [0], [0], [0, 0, 1, 0], [], []>, precision = #tpu.contract_precision<fp32>} : vector<16x128xf32>, vector<128x128xf32>, vector<16x128xf32> -> vector<16x128xf32>
    %4 = arith.mulf %0, %0 : vector<16x128xf32>
    %cst_5 = arith.constant dense<0.000000e+00> : vector<16xf32>
    %5 = vector.multi_reduction <add>, %4, %cst_5 [1] : vector<16x128xf32> to vector<16xf32>
    %6 = vector.shape_cast %5 : vector<16xf32> to vector<16x1xf32>
    %7 = math.sqrt %6 : vector<16x1xf32>
    %cst_6 = arith.constant 9.99999974E-6 : f32
    %8 = vector.broadcast %cst_6 : f32 to vector<16x1xf32>
    %9 = arith.addf %7, %8 : vector<16x1xf32>
    %10 = tpu.reciprocal %9 : vector<16x1xf32> -> vector<16x1xf32>
    %11 = vector.broadcast %10 : vector<16x1xf32> to vector<16x128xf32>
    %12 = arith.mulf %3, %11 : vector<16x128xf32>
    %13 = vector.broadcast %2 : vector<1x128xf32> to vector<16x128xf32>
    %14 = arith.mulf %12, %13 : vector<16x128xf32>
    %c0_7 = arith.constant 0 : index
    %c0_8 = arith.constant 0 : index
    %15 = vector.load %arg5[%c0_7, %c0_8] : memref<16x128xf32, #tpu.memory_space<vmem>>, vector<16x128xf32>
    tpu.vector_store %arg5[%c0_7, %c0_8], %14 {strides = array<i32>} : memref<16x128xf32, #tpu.memory_space<vmem>>, vector<16x128xf32>,
    return
  }
  func.func @transform_0(%arg0: i32, %arg1: i32) -> (i32, i32) {
    %c0_i32 = arith.constant 0 : i32
    %c0_i32_0 = arith.constant 0 : i32
    return %arg0, %c0_i32 : i32, i32
  }
  func.func @transform_1(%arg0: i32, %arg1: i32) -> (i32, i32) {
    %c0_i32 = arith.constant 0 : i32
    %c0_i32_0 = arith.constant 0 : i32
    return %arg1, %c0_i32 : i32, i32
  }
  func.func @transform_2(%arg0: i32, %arg1: i32) -> (i32, i32) {
    %c0_i32 = arith.constant 0 : i32
    %c0_i32_0 = arith.constant 0 : i32
    return %c0_i32, %arg1 : i32, i32
  }
  func.func @transform_3(%arg0: i32, %arg1: i32) -> (i32, i32) {
    %c0_i32 = arith.constant 0 : i32
    return %arg0, %arg1 : i32, i32
  }
}

</mosaic_0001>

<bundles_post_ra>
// kernel: tpu_custom_call.1
= control target key start
LH: loop header
LB: loop body
LE: loop exit
PB: predicated region body
PF: predicated region fallthrough
CT: control target
= control target key end

     0   :  { %8 = vsyncpa [#allocation3], 0  ;;  %s1606_s0 = inlined_call_operand.hbm [shape: f32[16,128], index: 0, kind: input, shape index: {}]   ;;  %s1607_s1 = inlined_call_operand.hbm [shape: f32[128,128], index: 1, kind: input, shape index: {}]   ;;  %s1608_s2 = inlined_call_operand.vmem [shape: f32[1,128], index: 2, kind: input, shape index: {}]   ;;  %s1609_s3 = inlined_call_operand.hbm [shape: f32[16,128], index: 3, kind: output, shape index: {}]  }
   0x1   :  { %9 = vsyncpa [#allocation6], 0 }
   0x2   :  { %10 = vsyncpa [#allocation4], 0  ;;  %s1198_s12 = smov [#allocation2]  }
   0x3   :  { %s16_s13 = sshll.u32 %s1198_s12, 4  ;;  %s17_s13 = int_to_ptr.vmem [resolvable:$true] %s16_s13 }
   0x4   :  { %s1140_s14 = scalar_lea.vmem %s17_s13, 256  ;;  %p1145_p1 = scmp.lt.s32.totalorder %s17_s13, %s17_s13 }
   0x5   :  { %p1141_p0 = scmp.ne.s32.totalorder %s17_s13, %s1140_s14  ;;  %p1146_p2 = scmp.lt.s32.totalorder %s1140_s14, %s1140_s14 }
   0x7   :  { %p1147_p3 = por %p1146_p2, %p1145_p1 }
   0x9   :  { %p1148_p4 = pnand %p1147_p3, %p1141_p0 }
   0xb   :  { %1151 = shalt.err (!%p1148_p4)
}
   0xc   :  { %s1199_s15 = smov 128   ;;  %s1200_s16 = smov 8  }
   0xd   :  { %22 = dma.hbm_to_vmem [thread:$0]  %s1606_s0, 256, %s17_s13, [#allocation3], %s1199_s15, %s1199_s15, %s1200_s16  }
   0xe   :  { %s1201_s19 = smov [#allocation5]  }
   0xf   :  { %s28_s20 = sshll.u32 %s1201_s19, 4  ;;  %s29_s20 = int_to_ptr.vmem [resolvable:$true] %s28_s20 }
  0x10   :  { %s1160_s21 = scalar_lea.vmem %s29_s20, 2048  ;;  %p1165_p6 = scmp.lt.s32.totalorder %s29_s20, %s29_s20 }
  0x11   :  { %p1161_p5 = scmp.ne.s32.totalorder %s29_s20, %s1160_s21  ;;  %p1166_p7 = scmp.lt.s32.totalorder %s1160_s21, %s1160_s21 }
  0x13   :  { %p1167_p8 = por %p1166_p7, %p1165_p6 }
  0x15   :  { %p1168_p9 = pnand %p1167_p8, %p1161_p5 }
  0x17   :  { %1171 = shalt.err (!%p1168_p9)
}
  0x18   :  { %34 = dma.hbm_to_vmem [thread:$0]  %s1607_s1, 2048, %s29_s20, [#allocation6], %s1199_s15, %s1199_s15, %s1200_s16  }
  0x19   :  { %1192 = dma.done.wait [#allocation3], 256  }
  0x1a   :  { %1193 = vsyncadd [#allocation3], 4294967040 }
  0x1b   :  { %1194 = dma.done.wait [#allocation6], 2048  }
  0x1c   :  { %1195 = vsyncadd [#allocation6], 4294965248  ;;  %v60_v0 = vld [vmem:[#allocation5 + $0x78] sm:$0xff]  ;;  %v59_v1 = vld [vmem:[#allocation5 + $0x70] sm:$0xff]  ;;  %s1202_s24 = smov [#allocation7]  }
  0x1d   :  { %v58_v2 = vld [vmem:[#allocation5 + $0x68] sm:$0xff]  ;;  %v1235_v3 = vand.u32 4294901760, %v60_v0  ;;  %v1237_v4 = vand.u32 4294901760, %v59_v1  ;;  %v57_v6 = vld [vmem:[#allocation5 + $0x60] sm:$0xff]  ;;  %v56_v7 = vld [vmem:[#allocation5 + $0x58] sm:$0xff]  ;;  %s787_s25 = sshll.u32 %s1202_s24, 4  ;;  %s788_s25 = int_to_ptr.vmem [resolvable:$true] %s787_s25 }
  0x1e   :  { %v1239_v5 = vand.u32 4294901760, %v58_v2  ;;  %v1241_v8 = vand.u32 4294901760, %v57_v6  ;;  %v1254_v12 = vand.u32 4294901760, %v56_v7  ;;  %v55_v16 = vld [vmem:[#allocation5 + $0x50] sm:$0xff]  ;;  %v54_v26 = vld [vmem:[#allocation5 + $0x48] sm:$0xff]  ;;  %v53_v31 = vld [vmem:[#allocation5 + $0x40] sm:$0xff]  ;;  %p1177_p11 = scmp.lt.s32.totalorder %s788_s25, %s788_s25 }
  0x1f   :  { %909 = vmatprep.subr.mxu0 %v1235_v3  ;;  %v1245_v9 = vsub.f32 %v60_v0, %v1235_v3  ;;  %v1248_v10 = vsub.f32 %v59_v1, %v1237_v4  ;;  %v1274_v20 = vand.u32 4294901760, %v55_v16  ;;  %v1286_v27 = vand.u32 4294901760, %v54_v26  ;;  %v1297_v33 = vld [vmem:[#allocation2] sm:$0xff]  ;;  %v52_v39 = vld [vmem:[#allocation5 + $0x38] sm:$0xff]  ;;  %v50_v55 = vld [vmem:[#allocation5 + $0x28] sm:$0xff]  ;;  %s1172_s26 = scalar_lea.vmem %s788_s25, 256 }
  0x20   :  { %v1251_v11 = vsub.f32 %v58_v2, %v1239_v5  ;;  %910 = vmatpush3.xpose.msra.mxu0 %v1235_v3  ;;  %v1267_v17 = vsub.f32 %v57_v6, %v1241_v8  ;;  %v1277_v21 = vsub.f32 %v56_v7, %v1254_v12  ;;  %v1300_v34 = vand.u32 4294901760, %v53_v31  ;;  %v51_v47 = vld [vmem:[#allocation5 + $0x30] sm:$0xff]  ;;  %v49_v61 = vld [vmem:[#allocation5 + $0x20] sm:$0xff]  ;;  %v48_v6 = vld [vmem:[#allocation5 + $0x18] sm:$0xff]  ;;  %p1173_p10 = scmp.ne.s32.totalorder %s788_s25, %s1172_s26  ;;  %p1178_p12 = scmp.lt.s32.totalorder %s1172_s26, %s1172_s26 }
  0x21   :  { %911 = vmatprep.subr.mxu0 %v1237_v4  ;;  %v1258_v13 = vand.u32 4294901760, %v1245_v9  ;;  %v1261_v14 = vand.u32 4294901760, %v1248_v10  ;;  %v1295_v32 = vsub.f32 %v55_v16, %v1274_v20  ;;  %v1303_v35 = vand.u32 4294901760, %v1297_v33 }
  0x22   :  { %v1264_v15 = vand.u32 4294901760, %v1251_v11  ;;  %v1283_v25 = vand.u32 4294901760, %v1267_v17  ;;  %v1292_v30 = vand.u32 4294901760, %v1277_v21  ;;  %v1312_v40 = vsub.f32 %v54_v26, %v1286_v27  ;;  %p1179_p13 = por %p1178_p12, %p1177_p11 }
  0x23   :  { %v167_v18 = vsub.f32 %v1245_v9, %v1258_v13  ;;  %v174_v19 = vsub.f32 %v1248_v10, %v1261_v14  ;;  %v1309_v38 = vand.u32 4294901760, %v1295_v32  ;;  %v1316_v41 = vsub.f32 %v1297_v33, %v1303_v35  ;;  %976 = vmatprep.mubr.f32.mxu1 %v1303_v35 }
  0x24   :  { %912 = vmatpush3.xpose.msra.mxu0 %v1237_v4  ;;  %v181_v24 = vsub.f32 %v1251_v11, %v1264_v15  ;;  %v188_v29 = vsub.f32 %v1267_v17, %v1283_v25  ;;  %v195_v37 = vsub.f32 %v1277_v21, %v1292_v30  ;;  %v1320_v42 = vand.u32 4294901760, %v52_v39  ;;  %p1180_p0 = pnand %p1179_p13, %p1173_p10 }
  0x25   :  { %913 = vmatprep.subr.mxu0 %v1239_v5  ;;  %v168_v22 = vand.u32 4294901760, %v167_v18  ;;  %v175_v23 = vand.u32 4294901760, %v174_v19  ;;  %v145_v43 = vand.u32 4294901760, %v1316_v41  ;;  %v202_v45 = vsub.f32 %v1295_v32, %v1309_v38 }
  0x26   :  { %v182_v28 = vand.u32 4294901760, %v181_v24  ;;  %v189_v36 = vand.u32 4294901760, %v188_v29  ;;  %v196_v44 = vand.u32 4294901760, %v195_v37  ;;  %v1327_v46 = vand.u32 4294901760, %v1312_v40 }
  0x27   :  { %944 = vmatprep.subr.mxu1 %v168_v22  ;;  %v1330_v48 = vsub.f32 %v53_v31, %v1300_v34  ;;  %v146_v49 = vsub.f32 %v1316_v41, %v145_v43  ;;  %v1336_v50 = vand.u32 4294901760, %v51_v47  ;;  %v203_v52 = vand.u32 4294901760, %v202_v45 }
  0x28   :  { %914 = vmatpush3.xpose.msra.mxu0 %v1239_v5  ;;  %945 = vmatpush3.xpose.msra.mxu1 %v168_v22  ;;  %v209_v53 = vsub.f32 %v1312_v40, %v1327_v46  ;;  %v1345_v56 = vsub.f32 %v52_v39, %v1320_v42  ;;  %v1348_v57 = vand.u32 4294901760, %v50_v55  ;;  %v1360_v63 = vand.u32 4294901760, %v49_v61 }
  0x29   :  { %915 = vmatprep.subr.mxu0 %v1241_v8  ;;  %946 = vmatprep.subr.mxu1 %v175_v23  ;;  %v147_v51 = vand.u32 4294901760, %v146_v49  ;;  %v1342_v54 = vand.u32 4294901760, %v1330_v48  ;;  %v1357_v62 = vsub.f32 %v51_v47, %v1336_v50  ;;  %v1372_v16 = vand.u32 4294901760, %v48_v6 }
  0x2a   :  { %v210_v58 = vand.u32 4294901760, %v209_v53  ;;  %v1354_v60 = vand.u32 4294901760, %v1345_v56  ;;  %v1369_v7 = vsub.f32 %v50_v55, %v1348_v57  ;;  %v1381_v24 = vsub.f32 %v49_v61, %v1360_v63 }
  0x2b   :  { %941 = vmatprep.mubr.f32.mxu0 %v147_v51  ;;  %v216_v59 = vsub.f32 %v1330_v48, %v1342_v54  ;;  %v1366_v2 = vand.u32 4294901760, %v1357_v62  ;;  %v1393_v37 = vsub.f32 %v48_v6, %v1372_v16  ;;  %v45_v51 = vld [vmem:[#allocation5] sm:$0xff] }
  0x2c   :  { %916 = vmatpush3.xpose.msra.mxu0 %v1241_v8  ;;  %947 = vmatpush3.xpose.msra.mxu1 %v175_v23  ;;  %v223_v1 = vsub.f32 %v1345_v56, %v1354_v60  ;;  %v1378_v22 = vand.u32 4294901760, %v1369_v7  ;;  %v47_v23 = vld [vmem:[#allocation5 + $0x10] sm:$0xff]  ;;  %v1390_v31 = vand.u32 4294901760, %v1381_v24  ;;  %v1413_v55 = vand.u32 4294901760, %v45_v51 }
  0x2d   :  { %917 = vmatprep.subr.mxu0 %v1254_v12  ;;  %948 = vmatprep.subr.mxu1 %v182_v28  ;;  %v217_v0 = vand.u32 4294901760, %v216_v59  ;;  %v230_v19 = vsub.f32 %v1357_v62, %v1366_v2  ;;  %v1384_v26 = vand.u32 4294901760, %v47_v23  ;;  %v1404_v49 = vand.u32 4294901760, %v1393_v37 }
  0x2e   :  { %v224_v18 = vand.u32 4294901760, %v223_v1  ;;  %v237_v29 = vsub.f32 %v1369_v7, %v1378_v22  ;;  %v244_v47 = vsub.f32 %v1381_v24, %v1390_v31 }
  0x2f   :  { %v251_v59 = vsub.f32 %v1393_v37, %v1404_v49 }
  0x30   :  { %918 = vmatpush3.xpose.msra.mxu0 %v1254_v12  ;;  %949 = vmatpush3.xpose.msra.mxu1 %v182_v28  ;;  %v231_v28 = vand.u32 4294901760, %v230_v19  ;;  %v238_v45 = vand.u32 4294901760, %v237_v29 }
  0x31   :  { %919 = vmatprep.subr.mxu0 %v1274_v20  ;;  %950 = vmatprep.subr.mxu1 %v189_v36  ;;  %v252_v6 = vand.u32 4294901760, %v251_v59 }
  0x34   :  { %920 = vmatpush3.xpose.msra.mxu0 %v1274_v20  ;;  %951 = vmatpush3.xpose.msra.mxu1 %v189_v36  ;;  %v46_v36 = vld [vmem:[#allocation5 + $0x8] sm:$0xff] }
  0x35   :  { %921 = vmatprep.subr.mxu0 %v1286_v27  ;;  %952 = vmatprep.subr.mxu1 %v196_v44  ;;  %v1396_v39 = vand.u32 4294901760, %v46_v36 }
  0x38   :  { %922 = vmatpush3.xpose.msra.mxu0 %v1286_v27  ;;  %953 = vmatpush3.xpose.msra.mxu1 %v196_v44  ;;  %v1398_v44 = vld [vmem:[#allocation2 + $0x8] sm:$0xff] }
  0x39   :  { %923 = vmatprep.subr.mxu0 %v1300_v34  ;;  %954 = vmatprep.subr.mxu1 %v203_v52  ;;  %v1410_v53 = vand.u32 4294901760, %v1398_v44 }
  0x3b   :  { %v1426_v1 = vsub.f32 %v1398_v44, %v1410_v53 }
  0x3c   :  { %924 = vmatpush3.xpose.msra.mxu0 %v1300_v34  ;;  %955 = vmatpush3.xpose.msra.mxu1 %v203_v52  ;;  %v1407_v52 = vsub.f32 %v47_v23, %v1384_v26  ;;  %v1436_v23 = vsub.f32 %v45_v51, %v1413_v55 }
  0x3d   :  { %925 = vmatprep.subr.mxu0 %v1320_v42  ;;  %956 = vmatprep.subr.mxu1 %v210_v58 }
  0x3e   :  { %v1419_v61 = vand.u32 4294901760, %v1407_v52 }
  0x40   :  { %926 = vmatpush3.xpose.msra.mxu0 %v1320_v42  ;;  %957 = vmatpush3.xpose.msra.mxu1 %v210_v58  ;;  %v245_v58 = vand.u32 4294901760, %v244_v47 }
  0x41   :  { %927 = vmatprep.subr.mxu0 %v1336_v50  ;;  %958 = vmatprep.subr.mxu1 %v217_v0 }
  0x44   :  { %928 = vmatpush3.xpose.msra.mxu0 %v1336_v50  ;;  %959 = vmatpush3.xpose.msra.mxu1 %v217_v0  ;;  %v1422_v0 = vsub.f32 %v46_v36, %v1396_v39 }
  0x45   :  { %929 = vmatprep.subr.mxu0 %v1348_v57  ;;  %960 = vmatprep.subr.mxu1 %v224_v18 }
  0x46   :  { %v1433_v19 = vand.u32 4294901760, %v1422_v0 }
  0x48   :  { %930 = vmatpush3.xpose.msra.mxu0 %v1348_v57  ;;  %961 = vmatpush3.xpose.msra.mxu1 %v224_v18  ;;  %v258_v18 = vsub.f32 %v1407_v52, %v1419_v61  ;;  %v265_v36 = vsub.f32 %v1422_v0, %v1433_v19 }
  0x49   :  { %931 = vmatprep.subr.mxu0 %v1360_v63  ;;  %962 = vmatprep.subr.mxu1 %v231_v28 }
  0x4a   :  { %v259_v29 = vand.u32 4294901760, %v258_v18  ;;  %v266_v51 = vand.u32 4294901760, %v265_v36 }
  0x4c   :  { %932 = vmatpush3.xpose.msra.mxu0 %v1360_v63  ;;  %963 = vmatpush3.xpose.msra.mxu1 %v231_v28  ;;  %v155_v28 = vand.u32 4294901760, %v1426_v1 }
  0x4d   :  { %933 = vmatprep.subr.mxu0 %v1372_v16  ;;  %964 = vmatprep.subr.mxu1 %v238_v45 }
  0x4e   :  { %v156_v47 = vsub.f32 %v1426_v1, %v155_v28 }
  0x50   :  { %934 = vmatpush3.xpose.msra.mxu0 %v1372_v16  ;;  %965 = vmatpush3.xpose.msra.mxu1 %v238_v45  ;;  %v1444_v45 = vand.u32 4294901760, %v1436_v23  ;;  %v157_v59 = vand.u32 4294901760, %v156_v47 }
  0x51   :  { %935 = vmatprep.subr.mxu0 %v1384_v26  ;;  %966 = vmatprep.subr.mxu1 %v245_v58 }
  0x54   :  { %936 = vmatpush3.xpose.msra.mxu0 %v1384_v26  ;;  %967 = vmatpush3.xpose.msra.mxu1 %v245_v58  ;;  %v272_v58 = vsub.f32 %v1436_v23, %v1444_v45 }
  0x55   :  { %937 = vmatprep.subr.mxu0 %v1396_v39  ;;  %968 = vmatprep.subr.mxu1 %v252_v6 }
  0x56   :  { %v273_v18 = vand.u32 4294901760, %v272_v58 }
  0x58   :  { %938 = vmatpush3.xpose.msra.mxu0 %v1396_v39  ;;  %969 = vmatpush3.xpose.msra.mxu1 %v252_v6  ;;  %v746_v6 = vmul.f32 %v1297_v33, %v1297_v33 }
  0x59   :  { %939 = vmatprep.subr.mxu0 %v1413_v55  ;;  %970 = vmatprep.subr.mxu1 %v259_v29 }
  0x5a   :  { %748 = vadd.xlane.f32.xlu0 %v746_v6 }
  0x5c   :  { %940 = vmatpush3.xpose.msra.mxu0 %v1413_v55  ;;  %971 = vmatpush3.xpose.msra.mxu1 %v259_v29 }
  0x5d   :  { %972 = vmatprep.subr.mxu1 %v266_v51  ;;  %979 = vmatprep.subr.mxu0 %v1245_v9 }
  0x5f   :  { %942 = vmatmul.mubr.f32.vlgmr.msra.gmra.mxu0 %v157_v59 }
  0x60   :  { %973 = vmatpush3.xpose.msra.mxu1 %v266_v51  ;;  %980 = vmatpush3.xpose.msra.mxu0 %v1245_v9  ;;  %v747_v9 = vmul.f32 %v1398_v44, %v1398_v44 }
  0x61   :  { %974 = vmatprep.subr.mxu1 %v273_v18  ;;  %981 = vmatprep.subr.mxu0 %v1248_v10 }
  0x62   :  { %1011 = vmatprep.mubr.f32.mxu0 %v1316_v41  ;;  %750 = vadd.xlane.f32.xlu0 %v747_v9 }
  0x64   :  { %975 = vmatpush3.xpose.msra.mxu1 %v273_v18  ;;  %982 = vmatpush3.xpose.msra.mxu0 %v1248_v10 }
  0x65   :  { %983 = vmatprep.subr.mxu0 %v1251_v11  ;;  %1014 = vmatprep.subr.mxu1 %v1235_v3 }
  0x67   :  { %977 = vmatmul.mubr.f32.vlgmr.msra.gmra.mxu1 %v1410_v53 }
  0x68   :  { %984 = vmatpush3.xpose.msra.mxu0 %v1251_v11  ;;  %1015 = vmatpush3.xpose.msra.mxu1 %v1235_v3 }
  0x69   :  { %985 = vmatprep.subr.mxu0 %v1267_v17  ;;  %1016 = vmatprep.subr.mxu1 %v1237_v4 }
  0x6a   :  { %1046 = vmatprep.mubr.f32.mxu1 %v145_v43 }
  0x6c   :  { %986 = vmatpush3.xpose.msra.mxu0 %v1267_v17  ;;  %1017 = vmatpush3.xpose.msra.mxu1 %v1237_v4 }
  0x6d   :  { %987 = vmatprep.subr.mxu0 %v1277_v21  ;;  %1018 = vmatprep.subr.mxu1 %v1239_v5 }
  0x70   :  { %988 = vmatpush3.xpose.msra.mxu0 %v1277_v21  ;;  %1019 = vmatpush3.xpose.msra.mxu1 %v1239_v5 }
  0x71   :  { %989 = vmatprep.subr.mxu0 %v1295_v32  ;;  %1020 = vmatprep.subr.mxu1 %v1241_v8 }
  0x74   :  { %990 = vmatpush3.xpose.msra.mxu0 %v1295_v32  ;;  %1021 = vmatpush3.xpose.msra.mxu1 %v1241_v8 }
  0x75   :  { %991 = vmatprep.subr.mxu0 %v1312_v40  ;;  %1022 = vmatprep.subr.mxu1 %v1254_v12 }
  0x78   :  { %992 = vmatpush3.xpose.msra.mxu0 %v1312_v40  ;;  %1023 = vmatpush3.xpose.msra.mxu1 %v1254_v12 }
  0x79   :  { %993 = vmatprep.subr.mxu0 %v1330_v48  ;;  %1024 = vmatprep.subr.mxu1 %v1274_v20 }
  0x7c   :  { %994 = vmatpush3.xpose.msra.mxu0 %v1330_v48  ;;  %1025 = vmatpush3.xpose.msra.mxu1 %v1274_v20 }
  0x7d   :  { %995 = vmatprep.subr.mxu0 %v1345_v56  ;;  %1026 = vmatprep.subr.mxu1 %v1286_v27 }
  0x80   :  { %996 = vmatpush3.xpose.msra.mxu0 %v1345_v56  ;;  %1027 = vmatpush3.xpose.msra.mxu1 %v1286_v27 }
  0x81   :  { %997 = vmatprep.subr.mxu0 %v1357_v62  ;;  %1028 = vmatprep.subr.mxu1 %v1300_v34 }
  0x84   :  { %998 = vmatpush3.xpose.msra.mxu0 %v1357_v62  ;;  %1029 = vmatpush3.xpose.msra.mxu1 %v1300_v34 }
  0x85   :  { %999 = vmatprep.subr.mxu0 %v1369_v7  ;;  %1030 = vmatprep.subr.mxu1 %v1320_v42 }
  0x88   :  { %1000 = vmatpush3.xpose.msra.mxu0 %v1369_v7  ;;  %1031 = vmatpush3.xpose.msra.mxu1 %v1320_v42  ;;  %v800_v7 = vld [vmem:[%s1608_s2] ss:$0 sm:$0xff] }
  0x89   :  { %1001 = vmatprep.subr.mxu0 %v1381_v24  ;;  %1032 = vmatprep.subr.mxu1 %v1336_v50 }
  0x8c   :  { %1002 = vmatpush3.xpose.msra.mxu0 %v1381_v24  ;;  %1033 = vmatpush3.xpose.msra.mxu1 %v1336_v50 }
  0x8d   :  { %1003 = vmatprep.subr.mxu0 %v1393_v37  ;;  %1034 = vmatprep.subr.mxu1 %v1348_v57 }
  0x90   :  { %1004 = vmatpush3.xpose.msra.mxu0 %v1393_v37  ;;  %1035 = vmatpush3.xpose.msra.mxu1 %v1348_v57 }
  0x91   :  { %1005 = vmatprep.subr.mxu0 %v1407_v52  ;;  %1036 = vmatprep.subr.mxu1 %v1360_v63 }
  0x94   :  { %1006 = vmatpush3.xpose.msra.mxu0 %v1407_v52  ;;  %1037 = vmatpush3.xpose.msra.mxu1 %v1360_v63 }
  0x95   :  { %1007 = vmatprep.subr.mxu0 %v1422_v0  ;;  %1038 = vmatprep.subr.mxu1 %v1372_v16 }
  0x98   :  { %1008 = vmatpush3.xpose.msra.mxu0 %v1422_v0  ;;  %1039 = vmatpush3.xpose.msra.mxu1 %v1372_v16 }
  0x99   :  { %1009 = vmatprep.subr.mxu0 %v1436_v23  ;;  %1040 = vmatprep.subr.mxu1 %v1384_v26 }
  0x9c   :  { %1010 = vmatpush3.xpose.msra.mxu0 %v1436_v23  ;;  %1041 = vmatpush3.xpose.msra.mxu1 %v1384_v26 }
  0x9d   :  { %1042 = vmatprep.subr.mxu1 %v1396_v39  ;;  %1049 = vmatprep.subr.mxu0 %v1258_v13 }
  0x9f   :  { %1012 = vmatmul.mubr.f32.vlgmr.msra.gmra.mxu0 %v1426_v1 }
  0xa0   :  { %1043 = vmatpush3.xpose.msra.mxu1 %v1396_v39  ;;  %1050 = vmatpush3.xpose.msra.mxu0 %v1258_v13 }
  0xa1   :  { %1044 = vmatprep.subr.mxu1 %v1413_v55  ;;  %1051 = vmatprep.subr.mxu0 %v1261_v14 }
  0xa2   :  { %1081 = vmatprep.mubr.f32.mxu0 %v1303_v35 }
  0xa4   :  { %1045 = vmatpush3.xpose.msra.mxu1 %v1413_v55  ;;  %1052 = vmatpush3.xpose.msra.mxu0 %v1261_v14 }
  0xa5   :  { %1053 = vmatprep.subr.mxu0 %v1264_v15  ;;  %1084 = vmatprep.subr.mxu1 %v1235_v3 }
  0xa7   :  { %1047 = vmatmul.mubr.f32.vlgmr.msra.gmra.mxu1 %v155_v28 }
  0xa8   :  { %1054 = vmatpush3.xpose.msra.mxu0 %v1264_v15  ;;  %1085 = vmatpush3.xpose.msra.mxu1 %v1235_v3 }
  0xa9   :  { %1055 = vmatprep.subr.mxu0 %v1283_v25  ;;  %1086 = vmatprep.subr.mxu1 %v1237_v4 }
  0xaa   :  { %1116 = vmatprep.mubr.f32.mxu1 %v1303_v35 }
  0xac   :  { %1056 = vmatpush3.xpose.msra.mxu0 %v1283_v25  ;;  %1087 = vmatpush3.xpose.msra.mxu1 %v1237_v4 }
  0xad   :  { %1057 = vmatprep.subr.mxu0 %v1292_v30  ;;  %1088 = vmatprep.subr.mxu1 %v1239_v5 }
  0xb0   :  { %1058 = vmatpush3.xpose.msra.mxu0 %v1292_v30  ;;  %1089 = vmatpush3.xpose.msra.mxu1 %v1239_v5 }
  0xb1   :  { %1059 = vmatprep.subr.mxu0 %v1309_v38  ;;  %1090 = vmatprep.subr.mxu1 %v1241_v8 }
  0xb4   :  { %1060 = vmatpush3.xpose.msra.mxu0 %v1309_v38  ;;  %1091 = vmatpush3.xpose.msra.mxu1 %v1241_v8 }
  0xb5   :  { %1061 = vmatprep.subr.mxu0 %v1327_v46  ;;  %1092 = vmatprep.subr.mxu1 %v1254_v12 }
  0xb8   :  { %1062 = vmatpush3.xpose.msra.mxu0 %v1327_v46  ;;  %1093 = vmatpush3.xpose.msra.mxu1 %v1254_v12 }
  0xb9   :  { %1063 = vmatprep.subr.mxu0 %v1342_v54  ;;  %1094 = vmatprep.subr.mxu1 %v1274_v20 }
  0xbc   :  { %1064 = vmatpush3.xpose.msra.mxu0 %v1342_v54  ;;  %1095 = vmatpush3.xpose.msra.mxu1 %v1274_v20 }
  0xbd   :  { %1065 = vmatprep.subr.mxu0 %v1354_v60  ;;  %1096 = vmatprep.subr.mxu1 %v1286_v27 }
  0xc0   :  { %1066 = vmatpush3.xpose.msra.mxu0 %v1354_v60  ;;  %1097 = vmatpush3.xpose.msra.mxu1 %v1286_v27 }
  0xc1   :  { %1067 = vmatprep.subr.mxu0 %v1366_v2  ;;  %1098 = vmatprep.subr.mxu1 %v1300_v34 }
  0xc4   :  { %1068 = vmatpush3.xpose.msra.mxu0 %v1366_v2  ;;  %1099 = vmatpush3.xpose.msra.mxu1 %v1300_v34 }
  0xc5   :  { %1069 = vmatprep.subr.mxu0 %v1378_v22  ;;  %1100 = vmatprep.subr.mxu1 %v1320_v42 }
  0xc8   :  { %1070 = vmatpush3.xpose.msra.mxu0 %v1378_v22  ;;  %1101 = vmatpush3.xpose.msra.mxu1 %v1320_v42 }
  0xc9   :  { %1071 = vmatprep.subr.mxu0 %v1390_v31  ;;  %1102 = vmatprep.subr.mxu1 %v1336_v50 }
  0xcc   :  { %1072 = vmatpush3.xpose.msra.mxu0 %v1390_v31  ;;  %1103 = vmatpush3.xpose.msra.mxu1 %v1336_v50 }
  0xcd   :  { %1073 = vmatprep.subr.mxu0 %v1404_v49  ;;  %1104 = vmatprep.subr.mxu1 %v1348_v57 }
  0xd0   :  { %1074 = vmatpush3.xpose.msra.mxu0 %v1404_v49  ;;  %1105 = vmatpush3.xpose.msra.mxu1 %v1348_v57 }
  0xd1   :  { %1075 = vmatprep.subr.mxu0 %v1419_v61  ;;  %1106 = vmatprep.subr.mxu1 %v1360_v63 }
  0xd4   :  { %1076 = vmatpush3.xpose.msra.mxu0 %v1419_v61  ;;  %1107 = vmatpush3.xpose.msra.mxu1 %v1360_v63 }
  0xd5   :  { %1077 = vmatprep.subr.mxu0 %v1433_v19  ;;  %1108 = vmatprep.subr.mxu1 %v1372_v16 }
  0xd8   :  { %1078 = vmatpush3.xpose.msra.mxu0 %v1433_v19  ;;  %1109 = vmatpush3.xpose.msra.mxu1 %v1372_v16 }
  0xd9   :  { %1079 = vmatprep.subr.mxu0 %v1444_v45  ;;  %1110 = vmatprep.subr.mxu1 %v1384_v26 }
  0xdc   :  { %1080 = vmatpush3.xpose.msra.mxu0 %v1444_v45  ;;  %1111 = vmatpush3.xpose.msra.mxu1 %v1384_v26 }
  0xdd   :  { %1112 = vmatprep.subr.mxu1 %v1396_v39 }
  0xdf   :  { %1082 = vmatmul.mubr.f32.vlgmr.msra.gmra.mxu0 %v1410_v53 }
  0xe0   :  { %1113 = vmatpush3.xpose.msra.mxu1 %v1396_v39 }
  0xe1   :  { %1114 = vmatprep.subr.mxu1 %v1413_v55 }
  0xe3   :  { %v749_v3 = vpop.xlane.xlu0 %748 }
  0xe4   :  { %1115 = vmatpush3.xpose.msra.mxu1 %v1413_v55  ;;  %vm754_vm1 = vcmp.eq.f32.partialorder %v749_v3, inf  ;;  %v757_v14 = vand.u32 2147483648, %v749_v3  ;;  %vm756_vm3 = vcmp.eq.f32.partialorder %v749_v3, 0.0 }
  0xe7   :  { %1117 = vmatmul.mubr.f32.vlgmr.msra.gmra.mxu1 %v1410_v53 }
  0xeb   :  { %v751_v4 = vpop.xlane.xlu0 %750 }
  0xec   :  { %1124 = vrsqrt.f32 %v751_v4  ;;  %vm761_vm0 = vcmp.eq.f32.partialorder %v751_v4, inf  ;;  %v764_v12 = vand.u32 2147483648, %v751_v4  ;;  %vm763_vm2 = vcmp.eq.f32.partialorder %v751_v4, 0.0 }
  0xed   :  { %1126 = vrsqrt.f32 %v749_v3 }
  0xf9   :  { %v1125_v5 = vpop.eup %1124 }
  0xfa   :  { %v1127_v8 = vpop.eup %1126  ;;  %v760_v10 = vmul.f32 %v1125_v5, %v751_v4 }
  0xfb   :  { %v753_v11 = vmul.f32 %v1127_v8, %v749_v3 }
  0xfc   :  { %v762_v13 = vsel %vm761_vm0, %v751_v4, %v760_v10 }
  0xfd   :  { %v755_v15 = vsel %vm754_vm1, %v749_v3, %v753_v11  ;;  %v765_v20 = vsel %vm763_vm2, %v764_v12, %v762_v13 }
  0xfe   :  { %v758_v21 = vsel %vm756_vm3, %v757_v14, %v755_v15  ;;  %v767_v25 = vadd.f32 1e-05, %v765_v20 }
  0xff   :  { %v766_v32 = vadd.f32 1e-05, %v758_v21 }
 0x100   :  { %1128 = vrcp.f32 %v767_v25 }
 0x101   :  { %1130 = vrcp.f32 %v766_v32 }
 0x10d   :  { %v1129_v2 = vpop.eup %1128 }
 0x10e   :  { %v1131_v26 = vpop.eup %1130 }
 0x11f   :  { %v943_v17 = vpop.f32.mrf.mxu0 }
 0x121   :  { %v149_v27 = vpop.f32.mrf.mxu0 }
 0x127   :  { %v978_v30 = vpop.f32.mrf.mxu1 }
 0x128   :  { %v317_v40 = vadd.f32 %v978_v30, %v943_v17 }
 0x129   :  { %v310_v34 = vpop.f32.mrf.mxu1 }
 0x12a   :  { %v311_v42 = vadd.f32 %v310_v34, %v149_v27 }
 0x15f   :  { %v1013_v33 = vpop.f32.mrf.mxu0 }
 0x160   :  { %v428_v43 = vadd.f32 %v1013_v33, %v317_v40 }
 0x161   :  { %v420_v35 = vpop.f32.mrf.mxu0 }
 0x162   :  { %v421_v48 = vadd.f32 %v420_v35, %v311_v42 }
 0x167   :  { %v1048_v38 = vpop.f32.mrf.mxu1 }
 0x168   :  { %v525_v50 = vadd.f32 %v1048_v38, %v428_v43 }
 0x169   :  { %v516_v46 = vpop.f32.mrf.mxu1 }
 0x16a   :  { %v517_v56 = vadd.f32 %v516_v46, %v421_v48 }
 0x19f   :  { %v1083_v41 = vpop.f32.mrf.mxu0 }
 0x1a0   :  { %v650_v57 = vadd.f32 %v1083_v41, %v525_v50 }
 0x1a1   :  { %v643_v54 = vpop.f32.mrf.mxu0 }
 0x1a2   :  { %v644_v62 = vadd.f32 %v643_v54, %v517_v56 }
 0x1a7   :  { %v1118_v60 = vpop.f32.mrf.mxu1 }
 0x1a8   :  { %v743_v63 = vadd.f32 %v1118_v60, %v650_v57 }
 0x1a9   :  { %v736_v16 = vpop.f32.mrf.mxu1 }
 0x1aa   :  { %v771_v22 = vmul.f32 %v1129_v2, %v743_v63  ;;  %v737_v24 = vadd.f32 %v736_v16, %v644_v62 }
 0x1ac   :  { %v779_v31 = vmul.f32 %v800_v7, %v771_v22  ;;  %v770_v37 = vmul.f32 %v1131_v26, %v737_v24 }
 0x1ae   :  { %781 = vst [vmem:[#allocation7 + $0x8] sm:$0xff] %v779_v31  ;;  %v778_v39 = vmul.f32 %v800_v7, %v770_v37 }
 0x1b0   :  { %780 = vst [vmem:[#allocation7] sm:$0xff] %v778_v39 }
 0x1b1   :  { %1183 = shalt.err (!%p1180_p0)
}
 0x1b2   :  { %793 = dma.vmem_to_hbm [thread:$0]  %s788_s25, 256, %s1609_s3, [#allocation4], %s1199_s15, %s1199_s15, %s1200_s16  }
 0x1b3   :  { %1196 = dma.done.wait [#allocation4], 256  }
 0x1b4   :  { %1197 = vsyncadd [#allocation4], 4294967040 }
 0x1b5   :  { %797 = vsyncpa [#allocation3], 1 }
 0x1b6   :  { %798 = vsyncpa [#allocation6], 1 }
 0x1b7   :  { %799 = vsyncpa [#allocation4], 1 }

</bundles_post_ra>
